<compile_context>
chip_gen: v7x
topology: tpu7x:2x2x1
jax: 0.10.0
libtpu: 0.0.40
codegen_flags: <defaults>
</compile_context>

<pallas_src>
import jax
import jax.numpy as jnp
from jax.experimental import pallas as pl
from jax.experimental.pallas import tpu as pltpu


def _round_up(x, m):
    return ((x + m - 1) // m) * m


def _reward_mlp_kernel(x_ref, w1_ref, w2_ref, b2_ref, w3t_ref, b3_ref, o_ref):
    """relu([x|1] @ [W1;b1]) -> relu(. @ W2 + b2) -> . @ w3 + b3 on one batch tile.

    Matmul operands are bf16, accumulation and all element-wise math are f32
    (v5e-safe split precision).  Layer 3 contracts both operands on their last
    dim (q.k^T-style) so the batch lands on lanes and the (1, TB) store is
    unmasked / lane-dense.
    """
    f32 = jnp.float32

    # ---- layer 1 (b1 folded into W1 via the ones column appended to x) ------
    h1 = jnp.dot(x_ref[...], w1_ref[...], preferred_element_type=f32)
    h1 = jnp.maximum(h1, 0.0)

    # ---- layer 2 -------------------------------------------------------------
    h2 = jnp.dot(h1.astype(w2_ref.dtype), w2_ref[...], preferred_element_type=f32)
    h2 = jnp.maximum(h2 + b2_ref[...], 0.0)

    # ---- layer 3: (8,H) x (TB,H)^T -> (8,TB); row 0 of w3t holds the weights --
    r8 = jax.lax.dot_general(
        w3t_ref[...], h2.astype(w3t_ref.dtype),
        dimension_numbers=(((1,), (1,)), ((), ())),
        preferred_element_type=f32,
    )
    o_ref[...] = r8[0:1, :] + b3_ref[0, 0]   # (1, TB), lane-dense store


def prepare_params(params):
    """One-time parameter prep.

    Folds b1 into W1 (extra row, matched by the ones column in x), zero-pads the
    hidden dim to 128 lanes, and casts matmul operands to bf16 (accumulation and
    the bias/ReLU epilogue stay f32 in-kernel).  Zero padding is an exact no-op
    because ReLU(0)=0 and padded W2 / w3 rows are zero.
    """
    w1, b1, w2, b2, w3, b3 = params
    _, hidden = w1.shape
    h_pad = max(128, _round_up(hidden, 128))
    ph = h_pad - hidden

    w1_aug = jnp.concatenate(
        [w1.astype(jnp.float32), b1.reshape(1, -1).astype(jnp.float32)], axis=0)
    w1_aug = jnp.pad(w1_aug, ((0, 0), (0, ph))).astype(jnp.bfloat16)   # (in_dim+1, h_pad)
    w2_p = jnp.pad(w2.astype(jnp.float32),
                   ((0, ph), (0, ph))).astype(jnp.bfloat16)            # (h_pad, h_pad)
    b2_p = jnp.pad(b2.reshape(1, -1).astype(jnp.float32), ((0, 0), (0, ph)))  # (1,h_pad) f32
    w3t = jnp.pad(w3.astype(jnp.float32).T,
                  ((0, 7), (0, ph))).astype(jnp.bfloat16)              # (8, h_pad), row0 real
    b3_p = b3.reshape(1, 1).astype(jnp.float32)                        # (1, 1) -> SMEM
    return (w1_aug, w2_p, b2_p, w3t, b3_p)


def reward_net_forward(state, action, next_state, done, prepared_params, *, tb_max=512):
    """state (B,obs), action (B,act), next_state (B,obs), done (B,) -> reward (B,),
    matching `rew_th.flatten()` of the PyTorch module."""
    w1_aug, w2_p, b2_p, w3t, b3_p = prepared_params
    in_dim_x = w1_aug.shape[0]
    h_pad = w1_aug.shape[1]
    assert tb_max % 128 == 0, tb_max

    b0 = state.shape[0]
    # Single fused input build: [state | action | next_state | done | 1] in bf16.
    x = jnp.concatenate(
        [state.reshape(b0, -1).astype(jnp.float32),
         action.reshape(b0, -1).astype(jnp.float32),
         next_state.reshape(b0, -1).astype(jnp.float32),
         done.reshape(b0, 1).astype(jnp.float32),
         jnp.ones((b0, 1), jnp.float32)], axis=-1).astype(jnp.bfloat16)
    assert x.shape[1] == in_dim_x, (x.shape, in_dim_x)

    # Batch tile: minimal padding for small B, two >=128-row tiles when possible
    # (v7x megacore wants >=2 "parallel" steps), capped at tb_max for large B.
    bt = _round_up(b0, 16)                    # bf16 sublane-packing granularity
    if bt > tb_max:
        tb = tb_max
    elif bt >= 256:
        tb = _round_up((bt + 1) // 2, 128)    # 2 grid steps
    else:
        tb = bt                               # single small tile
    bp = _round_up(b0, tb)
    if bp != b0:
        x = jnp.pad(x, ((0, bp - b0), (0, 0)))

    grid = (bp // tb,)

    flops = 2 * bp * (in_dim_x * h_pad + h_pad * h_pad + 8 * h_pad)
    bytes_accessed = (2 * bp * in_dim_x                       # x (bf16)
                      + 2 * (in_dim_x + h_pad + 8) * h_pad    # bf16 weights (read once)
                      + 4 * (h_pad + 1)                       # f32 biases
                      + 4 * bp)                               # f32 output

    # Resident (single-buffered) whole-array operands in VMEM / SMEM.
    vmem_resident = pl.BlockSpec(memory_space=pltpu.MemorySpace.VMEM)
    smem_scalar = pl.BlockSpec(memory_space=pltpu.MemorySpace.SMEM)

    out = pl.pallas_call(
        _reward_mlp_kernel,
        out_shape=jax.ShapeDtypeStruct((1, bp), jnp.float32),
        grid=grid,
        in_specs=[
            pl.BlockSpec((tb, in_dim_x), lambda i: (i, 0)),   # batch-tiled x (pipelined)
            vmem_resident,                                    # W1 (+ b1 row)
            vmem_resident,                                    # W2
            vmem_resident,                                    # b2
            vmem_resident,                                    # w3^T (8, h_pad)
            smem_scalar,                                      # b3
        ],
        out_specs=pl.BlockSpec((1, tb), lambda i: (0, i)),
        compiler_params=pltpu.CompilerParams(
            dimension_semantics=("parallel",)),
        cost_estimate=pl.CostEstimate(
            flops=flops, transcendentals=0, bytes_accessed=bytes_accessed),
    )(x, w1_aug, w2_p, b2_p, w3t, b3_p)

    return out[0, :b0]   # (B,), drop batch padding


def init_params(key, in_dim, hidden):
    """Deterministic synthetic parameter init (torch.nn.Linear-style shapes)."""
    k1, k2, k3, k4, k5, k6 = jax.random.split(key, 6)
    s1 = 1.0 / jnp.sqrt(jnp.float32(in_dim))
    s2 = 1.0 / jnp.sqrt(jnp.float32(hidden))
    w1 = jax.random.uniform(k1, (in_dim, hidden), jnp.float32, -s1, s1)
    b1 = jax.random.uniform(k4, (hidden,), jnp.float32, -s1, s1)
    w2 = jax.random.uniform(k2, (hidden, hidden), jnp.float32, -s2, s2)
    b2 = jax.random.uniform(k5, (hidden,), jnp.float32, -s2, s2)
    w3 = jax.random.uniform(k3, (hidden, 1), jnp.float32, -s2, s2)
    b3 = jax.random.uniform(k6, (1,), jnp.float32, -s2, s2)
    return (w1, b1, w2, b2, w3, b3)


if __name__ == "__main__":
    # Small shapes consistent with a vector-obs / discrete-action env.
    B = 8          # batch of transitions
    OBS_DIM = 16   # flattened observation dim
    ACT_DIM = 4    # one-hot action dim
    HIDDEN = 32

    key = jax.random.PRNGKey(0)
    ks, ka, kn, kd = jax.random.split(key, 4)

    state = jax.random.normal(ks, (B, OBS_DIM), jnp.float32)
    next_state = jax.random.normal(kn, (B, OBS_DIM), jnp.float32)
    # One-hot actions (as produced by disc_rew_preprocess_inputs for Discrete spaces).
    act_idx = jax.random.randint(ka, (B,), 0, ACT_DIM)
    action = jax.nn.one_hot(act_idx, ACT_DIM, dtype=jnp.float32)
    done = (jax.random.uniform(kd, (B,)) > 0.8).astype(jnp.float32)

    in_dim = 2 * OBS_DIM + ACT_DIM + 1   # 37: [s, a, ns, done]
    raw_params = init_params(jax.random.PRNGKey(42), in_dim, HIDDEN)
    prepared = prepare_params(raw_params)

    rew = reward_net_forward(state, action, next_state, done, prepared)
    rew = jax.block_until_ready(rew)

    # Pure-JAX reference using the SAME prepared (bf16, padded, bias-folded)
    # parameters and the same precision flow, so a tight tolerance is meaningful.
    w1_aug, w2_p, b2_p, w3t, b3_p = prepared
    x_ref = jnp.concatenate(
        [state, action, next_state, done.reshape(-1, 1), jnp.ones((B, 1), jnp.float32)],
        axis=-1).astype(jnp.bfloat16)
    h = jnp.maximum(jnp.dot(x_ref, w1_aug, preferred_element_type=jnp.float32), 0.0)
    h = jnp.maximum(jnp.dot(h.astype(jnp.bfloat16), w2_p,
                            preferred_element_type=jnp.float32) + b2_p, 0.0)
    ref = (jnp.dot(h.astype(jnp.bfloat16), w3t[0:1].T,
                   preferred_element_type=jnp.float32) + b3_p)[:, 0]

    assert rew.shape == (B,), rew.shape
    assert jnp.allclose(rew, ref, atol=1e-4, rtol=1e-4), (rew, ref)
    print("KERNEL_OK")
</pallas_src>

<mosaic_0001>
module attributes {stable_mosaic.version = 11 : i64} {
  func.func @_reward_mlp_kernel(%arg0: i32, %arg1: memref<16x38xbf16, #tpu.memory_space<vmem>>, %arg2: memref<38x128xbf16, #tpu.memory_space<vmem>>, %arg3: memref<128x128xbf16, #tpu.memory_space<vmem>>, %arg4: memref<1x128xf32, #tpu.memory_space<vmem>>, %arg5: memref<8x128xbf16, #tpu.memory_space<vmem>>, %arg6: memref<1x1xf32, #tpu.memory_space<smem>>, %arg7: memref<1x16xf32, #tpu.memory_space<vmem>>) attributes {dimension_semantics = [#tpu.dimension_semantics<parallel>], iteration_bounds = array<i64: 1>, scalar_prefetch = 0 : i64, scratch_operands = 0 : i64, tpu.core_type = #tpu.core_type<tc>, window_params = [{transform_indices = @transform_0, window_bounds = array<i64: 16, 38>}, {pipeline_mode = #tpu.pipeline_mode<synchronous>, transform_indices = @transform_1, window_bounds = array<i64: 38, 128>}, {pipeline_mode = #tpu.pipeline_mode<synchronous>, transform_indices = @transform_2, window_bounds = array<i64: 128, 128>}, {pipeline_mode = #tpu.pipeline_mode<synchronous>, transform_indices = @transform_3, window_bounds = array<i64: 1, 128>}, {pipeline_mode = #tpu.pipeline_mode<synchronous>, transform_indices = @transform_4, window_bounds = array<i64: 8, 128>}, {transform_indices = @transform_5, window_bounds = array<i64: 1, 1>}, {transform_indices = @transform_6, window_bounds = array<i64: 1, 16>}]} {
    %c0 = arith.constant 0 : index
    %c0_0 = arith.constant 0 : index
    %0 = vector.load %arg1[%c0, %c0_0] : memref<16x38xbf16, #tpu.memory_space<vmem>>, vector<16x38xbf16>
    %c0_1 = arith.constant 0 : index
    %c0_2 = arith.constant 0 : index
    %1 = vector.load %arg2[%c0_1, %c0_2] : memref<38x128xbf16, #tpu.memory_space<vmem>>, vector<38x128xbf16>
    %cst = arith.constant dense<0.000000e+00> : vector<16x128xf32>
    %2 = tpu.matmul %0, %1, %cst {dimension_numbers = #tpu.dot_dimension_numbers<[1], [0], [0], [1], [0, 0, 1, 1], [], []>} : vector<16x38xbf16>, vector<38x128xbf16>, vector<16x128xf32> -> vector<16x128xf32>
    %cst_3 = arith.constant 0.000000e+00 : f32
    %3 = vector.broadcast %cst_3 : f32 to vector<16x128xf32>
    %4 = arith.maximumf %2, %3 : vector<16x128xf32>
    %5 = arith.truncf %4 : vector<16x128xf32> to vector<16x128xbf16>
    %c0_4 = arith.constant 0 : index
    %c0_5 = arith.constant 0 : index
    %6 = vector.load %arg3[%c0_4, %c0_5] : memref<128x128xbf16, #tpu.memory_space<vmem>>, vector<128x128xbf16>
    %cst_6 = arith.constant dense<0.000000e+00> : vector<16x128xf32>
    %7 = tpu.matmul %5, %6, %cst_6 {dimension_numbers = #tpu.dot_dimension_numbers<[1], [0], [0], [1], [0, 0, 1, 1], [], []>} : vector<16x128xbf16>, vector<128x128xbf16>, vector<16x128xf32> -> vector<16x128xf32>
    %c0_7 = arith.constant 0 : index
    %c0_8 = arith.constant 0 : index
    %8 = vector.load %arg4[%c0_7, %c0_8] : memref<1x128xf32, #tpu.memory_space<vmem>>, vector<1x128xf32>
    %9 = vector.broadcast %8 : vector<1x128xf32> to vector<16x128xf32>
    %10 = arith.addf %7, %9 : vector<16x128xf32>
    %cst_9 = arith.constant 0.000000e+00 : f32
    %11 = vector.broadcast %cst_9 : f32 to vector<16x128xf32>
    %12 = arith.maximumf %10, %11 : vector<16x128xf32>
    %c0_10 = arith.constant 0 : index
    %c0_11 = arith.constant 0 : index
    %13 = vector.load %arg5[%c0_10, %c0_11] : memref<8x128xbf16, #tpu.memory_space<vmem>>, vector<8x128xbf16>
    %14 = arith.truncf %12 : vector<16x128xf32> to vector<16x128xbf16>
    %cst_12 = arith.constant dense<0.000000e+00> : vector<8x16xf32>
    %15 = tpu.matmul %13, %14, %cst_12 {dimension_numbers = #tpu.dot_dimension_numbers<[1], [1], [0], [0], [0, 0, 1, 0], [], []>} : vector<8x128xbf16>, vector<16x128xbf16>, vector<8x16xf32> -> vector<8x16xf32>
    %16 = vector.extract_strided_slice %15 {offsets = [0, 0], sizes = [1, 16], strides = [1, 1]} : vector<8x16xf32> to vector<1x16xf32>
    %c0_13 = arith.constant 0 : index
    %c0_14 = arith.constant 0 : index
    %17 = memref.load %arg6[%c0_13, %c0_14] : memref<1x1xf32, #tpu.memory_space<smem>>
    %18 = vector.broadcast %17 : f32 to vector<1x16xf32>
    %19 = arith.addf %16, %18 : vector<1x16xf32>
    %c0_15 = arith.constant 0 : index
    %c0_16 = arith.constant 0 : index
    %20 = vector.load %arg7[%c0_15, %c0_16] : memref<1x16xf32, #tpu.memory_space<vmem>>, vector<1x16xf32>
    tpu.vector_store %arg7[%c0_15, %c0_16], %19 {strides = array<i32>} : memref<1x16xf32, #tpu.memory_space<vmem>>, vector<1x16xf32>,
    return
  }
  func.func @transform_0(%arg0: i32) -> (i32, i32) {
    %c0_i32 = arith.constant 0 : i32
    %c0_i32_0 = arith.constant 0 : i32
    return %arg0, %c0_i32 : i32, i32
  }
  func.func @transform_1(%arg0: i32) -> (i32, i32) {
    %c0_i32 = arith.constant 0 : i32
    %c0_i32_0 = arith.constant 0 : i32
    %c0_i32_1 = arith.constant 0 : i32
    return %c0_i32, %c0_i32_0 : i32, i32
  }
  func.func @transform_2(%arg0: i32) -> (i32, i32) {
    %c0_i32 = arith.constant 0 : i32
    %c0_i32_0 = arith.constant 0 : i32
    %c0_i32_1 = arith.constant 0 : i32
    return %c0_i32, %c0_i32_0 : i32, i32
  }
  func.func @transform_3(%arg0: i32) -> (i32, i32) {
    %c0_i32 = arith.constant 0 : i32
    %c0_i32_0 = arith.constant 0 : i32
    %c0_i32_1 = arith.constant 0 : i32
    return %c0_i32, %c0_i32_0 : i32, i32
  }
  func.func @transform_4(%arg0: i32) -> (i32, i32) {
    %c0_i32 = arith.constant 0 : i32
    %c0_i32_0 = arith.constant 0 : i32
    %c0_i32_1 = arith.constant 0 : i32
    return %c0_i32, %c0_i32_0 : i32, i32
  }
  func.func @transform_5(%arg0: i32) -> (i32, i32) {
    %c0_i32 = arith.constant 0 : i32
    %c0_i32_0 = arith.constant 0 : i32
    %c0_i32_1 = arith.constant 0 : i32
    return %c0_i32, %c0_i32_0 : i32, i32
  }
  func.func @transform_6(%arg0: i32) -> (i32, i32) {
    %c0_i32 = arith.constant 0 : i32
    %c0_i32_0 = arith.constant 0 : i32
    return %c0_i32, %arg0 : i32, i32
  }
}

</mosaic_0001>

<bundles_post_ra>
// kernel: tpu_custom_call.1
= control target key start
LH: loop header
LB: loop body
LE: loop exit
PB: predicated region body
PF: predicated region fallthrough
CT: control target
= control target key end

     0   :  { %12 = vsyncpa [#allocation4], 0  ;;  %s621_s0 = inlined_call_operand.hbm [shape: bf16[16,38], index: 0, kind: input, shape index: {}]   ;;  %s622_s1 = inlined_call_operand.hbm [shape: bf16[38,128], index: 1, kind: input, shape index: {}]   ;;  %s623_s2 = inlined_call_operand.hbm [shape: bf16[128,128], index: 2, kind: input, shape index: {}]   ;;  %s624_s3 = inlined_call_operand.vmem [shape: f32[1,128], index: 3, kind: input, shape index: {}]   ;;  %s625_s4 = inlined_call_operand.vmem [shape: bf16[8,128], index: 4, kind: input, shape index: {}]   ;;  %s626_s5 = inlined_call_operand.<no memory space> [shape: f32[1,1], index: 5, kind: input, shape index: {}]   ;;  %s627_s6 = inlined_call_operand.hbm [shape: f32[1,16], index: 6, kind: output, shape index: {}]  }
   0x1   :  { %13 = vsyncpa [#allocation7], 0 }
   0x2   :  { %14 = vsyncpa [#allocation5], 0  ;;  %s502_s21 = smov [#allocation6]   ;;  %s503_s23 = smov [#allocation3]  }
   0x3   :  { %s32_s22 = sshll.u32 %s502_s21, 4  ;;  %s20_s24 = sshll.u32 %s503_s23, 4  ;;  %s33_s22 = int_to_ptr.vmem [resolvable:$true] %s32_s22  ;;  %s545_s24 = int_to_ptr.vmem [resolvable:$true] %s20_s24 }
   0x4   :  { %s408_s27 = scalar_lea.hbm %s622_s1, 320 }
   0x5   :  { %p409_p0 = scmp.ne.s32.totalorder %s622_s1, %s408_s27  ;;  %p412_p1 = scmp.lt.u32.totalorder %s408_s27, %s622_s1 }
   0x7   :  { %p414_p2 = pnand %p412_p1, %p409_p0 }
   0x9   :  { %417 = shalt.err (!%p414_p2)
}
   0xa   :  { %s418_s8 = scalar_lea.vmem %s33_s22, 320  ;;  %p423_p4 = scmp.lt.s32.totalorder %s33_s22, %s33_s22 }
   0xb   :  { %p419_p3 = scmp.ne.s32.totalorder %s33_s22, %s418_s8  ;;  %p424_p5 = scmp.lt.s32.totalorder %s418_s8, %s418_s8 }
   0xd   :  { %p425_p6 = por %p424_p5, %p423_p4 }
   0xf   :  { %p426_p7 = pnand %p425_p6, %p419_p3 }
  0x11   :  { %429 = shalt.err (!%p426_p7)
}
  0x12   :  { %s504_s9 = smov 64   ;;  %s505_s10 = smov 4  }
  0x13   :  { %38 = dma.hbm_to_vmem [thread:$0]  %s622_s1, 320, %s33_s22, [#allocation7], %s504_s9, %s504_s9, %s505_s10  }
  0x14   :  { %s430_s15 = scalar_lea.hbm %s621_s0, 128 }
  0x15   :  { %p431_p8 = scmp.ne.s32.totalorder %s621_s0, %s430_s15  ;;  %p434_p9 = scmp.lt.u32.totalorder %s430_s15, %s621_s0 }
  0x17   :  { %p436_p10 = pnand %p434_p9, %p431_p8 }
  0x19   :  { %439 = shalt.err (!%p436_p10)
}
  0x1a   :  { %s440_s20 = scalar_lea.vmem %s545_s24, 128  ;;  %p445_p12 = scmp.lt.s32.totalorder %s545_s24, %s545_s24 }
  0x1b   :  { %p441_p11 = scmp.ne.s32.totalorder %s545_s24, %s440_s20  ;;  %p446_p13 = scmp.lt.s32.totalorder %s440_s20, %s440_s20 }
  0x1d   :  { %p447_p0 = por %p446_p13, %p445_p12 }
  0x1f   :  { %p448_p1 = pnand %p447_p0, %p441_p11 }
  0x21   :  { %451 = shalt.err (!%p448_p1)
}
  0x22   :  { %26 = dma.hbm_to_vmem [thread:$0]  %s621_s0, 128, %s545_s24, [#allocation4], %s504_s9, %s504_s9, %s505_s10  }
  0x23   :  { %s506_s22 = smov [#allocation8]   ;;  %s452_s27 = scalar_lea.hbm %s623_s2, 1024 }
  0x24   :  { %s44_s23 = sshll.u32 %s506_s22, 4  ;;  %p453_p2 = scmp.ne.s32.totalorder %s623_s2, %s452_s27  ;;  %s45_s23 = int_to_ptr.vmem [resolvable:$true] %s44_s23 }
  0x25   :  { %p456_p3 = scmp.lt.u32.totalorder %s452_s27, %s623_s2 }
  0x27   :  { %p458_p4 = pnand %p456_p3, %p453_p2 }
  0x29   :  { %461 = shalt.err (!%p458_p4)
}
  0x2a   :  { %s462_s8 = scalar_lea.vmem %s45_s23, 1024  ;;  %p467_p6 = scmp.lt.s32.totalorder %s45_s23, %s45_s23 }
  0x2b   :  { %p463_p5 = scmp.ne.s32.totalorder %s45_s23, %s462_s8  ;;  %p468_p7 = scmp.lt.s32.totalorder %s462_s8, %s462_s8 }
  0x2d   :  { %p469_p8 = por %p468_p7, %p467_p6 }
  0x2f   :  { %p470_p9 = pnand %p469_p8, %p463_p5 }
  0x31   :  { %473 = shalt.err (!%p470_p9)
}
  0x32   :  { %50 = dma.hbm_to_vmem [thread:$0]  %s623_s2, 1024, %s45_s23, [#allocation7], %s504_s9, %s504_s9, %s505_s10  }
  0x33   :  { %496 = dma.done.wait [#allocation4], 128  }
  0x34   :  { %497 = vsyncadd [#allocation4], 4294967168 }
  0x35   :  { %498 = dma.done.wait [#allocation7], 1344  }
  0x36   :  { %499 = vsyncadd [#allocation7], 4294965952  ;;  %v507_v0 = vmov 0.0   ;;  %vm508_vm0 = vmmov 0   ;;  %v396_v1 = vld [vmem:[#allocation6] sm:$0xff]   ;;  %v397_v2 = vld [vmem:[#allocation6 + $0x8] sm:$0xff]   ;;  %v303_v32 = vstv %s626_s5 }
  0x37   :  { %352 = vmatprep.subr.bf16.mxu0 %v507_v0  ;;  %358 = vmatprep.mubr.msk.bf16.mxu0 %vm508_vm0, %v507_v0  ;;  %v398_v3 = vld [vmem:[#allocation6 + $0x10] ss:$0 sps:$4 sm:$0x77]   ;;  %vm98_vm1 = vcmask 1042432   ;;  %v400_v4 = vld [vmem:[#allocation8] sm:$0xff]   ;;  %v401_v5 = vld [vmem:[#allocation8 + $0x8] sm:$0xff]  }
  0x38   :  { %362 = vmatprep.subr.bf16.mxu1 %v507_v0  ;;  %378 = vmatprep.mubr.msk.bf16.mxu1 %vm508_vm0, %v507_v0  ;;  %v100_v6 = vsel %vm98_vm1, %v398_v3, 0  ;;  %v399_v7 = vld [vmem:[#allocation3] sm:$0xff]   ;;  %vm94_vm2 = vcmask 310272   ;;  %v402_v8 = vld [vmem:[#allocation8 + $0x10] sm:$0xff]   ;;  %v403_v9 = vld [vmem:[#allocation8 + $0x18] sm:$0xff]   ;;  %vm305_vm3 = vcmask 122880  }
  0x39   :  { %353 = vmatpush3.bf16.msra.mxu0 %v396_v1  ;;  %363 = vmatpush3.bf16.msra.mxu1 %v400_v4  ;;  %v404_v10 = vld [vmem:[#allocation8 + $0x20] sm:$0xff]   ;;  %v405_v11 = vld [vmem:[#allocation8 + $0x28] sm:$0xff]   ;;  %v406_v12 = vld [vmem:[#allocation8 + $0x30] sm:$0xff]  }
  0x3a   :  { %354 = vmatprep.subr.bf16.mxu0 %v507_v0  ;;  %364 = vmatprep.subr.bf16.mxu1 %v507_v0  ;;  %v407_v13 = vld [vmem:[#allocation8 + $0x38] sm:$0xff]   ;;  %v328_v21 = vld [vmem:[%s624_s3] ss:$0 sm:$0xff]  ;;  %s509_s3 = smov [#allocation9]  }
  0x3b   :  { %v260_v31 = vld [vmem:[%s625_s4] sm:$0xf]  ;;  %s313_s14 = sshll.u32 %s509_s3, 4  ;;  %s314_s14 = int_to_ptr.vmem [resolvable:$true] %s313_s14 }
  0x3c   :  { %s474_s15 = scalar_lea.vmem %s314_s14, 16  ;;  %s478_s16 = scalar_lea.vmem %s314_s14, 32 }
  0x3d   :  { %355 = vmatpush3.bf16.msra.mxu0 %v397_v2  ;;  %365 = vmatpush3.bf16.msra.mxu1 %v401_v5  ;;  %p475_p10 = scmp.ne.s32.totalorder %s314_s14, %s474_s15  ;;  %p479_p11 = scmp.lt.s32.totalorder %s314_s14, %s314_s14 }
  0x3e   :  { %356 = vmatprep.subr.bf16.mxu0 %v507_v0  ;;  %366 = vmatprep.subr.bf16.mxu1 %v507_v0  ;;  %p480_p12 = scmp.lt.s32.totalorder %s478_s16, %s474_s15 }
  0x40   :  { %p481_p13 = por %p480_p12, %p479_p11 }
  0x41   :  { %357 = vmatpush3.bf16.msra.mxu0 %v100_v6  ;;  %367 = vmatpush3.bf16.msra.mxu1 %v402_v8 }
  0x42   :  { %382 = vmatprep.subr.bf16.mxu0 %v507_v0  ;;  %368 = vmatprep.subr.bf16.mxu1 %v507_v0  ;;  %p482_p0 = pnand %p481_p13, %p475_p10 }
  0x44   :  { %359 = vmatmul.mubr.msk.bf16.vlgmr.msra.gmra.mrb[0].mxu0 %vm94_vm2, %v399_v7 }
  0x45   :  { %384 = vmatprep.mubr.msk.bf16.mxu0 %vm508_vm0, %v507_v0  ;;  %369 = vmatpush3.bf16.msra.mxu1 %v403_v9 }
  0x46   :  { %370 = vmatprep.subr.bf16.mxu1 %v507_v0 }
  0x49   :  { %371 = vmatpush3.bf16.msra.mxu1 %v404_v10 }
  0x4a   :  { %372 = vmatprep.subr.bf16.mxu1 %v507_v0 }
  0x4d   :  { %373 = vmatpush3.bf16.msra.mxu1 %v405_v11 }
  0x4e   :  { %374 = vmatprep.subr.bf16.mxu1 %v507_v0 }
  0x51   :  { %375 = vmatpush3.bf16.msra.mxu1 %v406_v12 }
  0x52   :  { %376 = vmatprep.subr.bf16.mxu1 %v507_v0 }
  0x55   :  { %377 = vmatpush3.bf16.msra.mxu1 %v407_v13 }
 0x117   :  { %v136_v14 = vpop.f32.mrb[0].mxu0 }
 0x118   :  { %v360_v15 = vpop.f32.mrb[1].mxu0  ;;  %v143_v17 = vmax.f32 %v136_v14, 0.0 }
 0x119   :  { %v139_v16 = vpop.f32.mrb[2].mxu0 }
 0x11a   :  { %v144_v18 = vmax.f32 %v139_v16, 0.0  ;;  %v361_v19 = vpop.f32.mrb[3].mxu0 }
 0x11c   :  { %v145_v20 = vpack.c.bf16 %v144_v18, %v143_v17 }
 0x11e   :  { %379 = vmatmul.mubr.bf16.vlgmr.msra.gmra.mrb[0].mxu1 %v145_v20 }
 0x1f1   :  { %v251_v22 = vpop.f32.mrb[0].mxu1 }
 0x1f2   :  { %v252_v23 = vadd.f32 %v328_v21, %v251_v22  ;;  %v380_v24 = vpop.f32.mrb[1].mxu1 }
 0x1f3   :  { %v254_v25 = vpop.f32.mrb[2].mxu1 }
 0x1f4   :  { %v255_v26 = vadd.f32 %v328_v21, %v254_v25  ;;  %v381_v27 = vpop.f32.mrb[3].mxu1  ;;  %v258_v28 = vmax.f32 %v252_v23, 0.0 }
 0x1f6   :  { %v259_v29 = vmax.f32 %v255_v26, 0.0 }
 0x1f8   :  { %v261_v30 = vpack.c.bf16 %v259_v29, %v258_v28 }
 0x1fa   :  { %383 = vmatpush3.bf16.xpose.msra.mxu0 %v261_v30 }
 0x201   :  { %385 = vmatmul.mubr.bf16.vlgmr.msra.gmra.mrb[4].mxu0 %v260_v31 }
 0x2d4   :  { %v296_v33 = vpop.f32.mrb[4].mxu0 }
 0x2d5   :  { %v304_v34 = vadd.f32 %v303_v32, %v296_v33  ;;  %v386_v35 = vpop.f32.mrb[5].mxu0 }
 0x2d6   :  { %v299_v36 = vpop.f32.mrb[6].mxu0 }
 0x2d7   :  { %v387_v37 = vpop.f32.mrb[7].mxu0  ;;  %306 = vst.msk [vmem:[#allocation9] sm:$0x1] %vm305_vm3, %v304_v34 }
 0x2d8   :  { %485 = shalt.err (!%p482_p0)
}
 0x2d9   :  { %s486_s17 = scalar_lea.hbm %s627_s6, 16 }
 0x2da   :  { %p487_p1 = scmp.ne.s32.totalorder %s627_s6, %s486_s17  ;;  %p490_p2 = scmp.lt.u32.totalorder %s486_s17, %s627_s6 }
 0x2dc   :  { %p492_p3 = pnand %p490_p2, %p487_p1 }
 0x2de   :  { %495 = shalt.err (!%p492_p3)
}
 0x2df   :  { %316 = dma.vmem_to_hbm [thread:$0]  %s314_s14, 16, %s627_s6, [#allocation5]  }
 0x2e0   :  { %500 = dma.done.wait [#allocation5], 16  }
 0x2e1   :  { %501 = vsyncadd [#allocation5], 4294967280 }
 0x2e2   :  { %320 = vsyncpa [#allocation4], 1 }
 0x2e3   :  { %321 = vsyncpa [#allocation7], 1 }
 0x2e4   :  { %322 = vsyncpa [#allocation5], 1 }

</bundles_post_ra>
